<compile_context>
chip_gen: v5e
topology: v5e:2x2
jax: 0.10.0
libtpu: 0.0.40
codegen_flags: <defaults>
</compile_context>

<pallas_src>
import jax
import jax.numpy as jnp
from jax.experimental import pallas as pl
from jax.experimental.pallas import tpu as pltpu


def _copy_kernel(x_ref, o_ref):
    # Identity copy of one (row_tile, L) lane-dense tile.
    o_ref[...] = x_ref[...]


def _pick_lane_width(total, lane_cap):
    """Largest multiple of 128 that divides `total`, capped at `lane_cap`."""
    m = min(lane_cap, total)
    m = (m // 128) * 128
    while m >= 128:
        if total % m == 0:
            return m
        m -= 128
    return 0


def _pick_row_tile(rows, row_cap):
    """Largest multiple of 8 dividing `rows` (<= row_cap); else full extent."""
    m = min(row_cap, rows)
    m = (m // 8) * 8
    while m >= 8:
        if rows % m == 0:
            return m
        m -= 8
    return rows  # full-extent block along rows is always a legal block dim


def lin_view(x, c, a, b, *, lane_cap=2048, row_cap=256):
    """Pallas implementation of Lin_View.forward -> (batch, c, a, b)."""
    total = x.size
    feat = c * a * b
    n = x.shape[0] if x.ndim >= 1 else 1

    # Reproduce torch's try/except view semantics with static shapes.
    if n * feat == total:
        batch = n
    elif feat == total:
        batch = 1
    else:
        raise ValueError(
            f"cannot view array of size {total} as ({n} or 1, {c}, {a}, {b})"
        )
    out_shape4d = (batch, c, a, b)

    # Lane-dense slab: (rows, L) with L a multiple of 128.
    L = _pick_lane_width(total, lane_cap)
    if L == 0:
        # Element count not a multiple of 128 -> no clean lane-dense tiling.
        # Lin_View is a metadata-only reshape; this is the optimal path anyway.
        return jnp.reshape(x, out_shape4d)

    rows = total // L
    rt = _pick_row_tile(rows, row_cap)

    itemsize = jnp.dtype(x.dtype).itemsize
    # 2x double-buffered input blocks + 2x output blocks must fit the scoped
    # VMEM budget on every generation (v5e default is only 16 MiB).
    if 4 * rt * L * itemsize > 12 * 1024 * 1024:
        # TODO(synk): for huge, awkwardly-factored inputs fall back to the
        # zero-cost metadata reshape rather than risk a VMEM-oversized block.
        return jnp.reshape(x, out_shape4d)

    # Metadata-only row-major reshape to the lane-dense slab.
    slab = jnp.reshape(x, (rows, L))

    flat = pl.pallas_call(
        _copy_kernel,
        out_shape=jax.ShapeDtypeStruct((rows, L), x.dtype),
        grid=(rows // rt,),
        in_specs=[pl.BlockSpec((rt, L), lambda i: (i, 0))],
        out_specs=pl.BlockSpec((rt, L), lambda i: (i, 0)),
        compiler_params=pltpu.CompilerParams(
            dimension_semantics=("parallel",),  # shards across v7x's 2 TCs
        ),
        cost_estimate=pl.CostEstimate(
            flops=0,
            transcendentals=0,
            bytes_accessed=2 * total * itemsize,
        ),
    )(slab)

    # Zero-cost row-major unflatten to NCHW -- exactly torch's .view().
    return jnp.reshape(flat, out_shape4d)


if __name__ == "__main__":
    # Module config: Lin_View(c=4, a=8, b=16)  ->  feature size 512.
    C, A, B = 4, 8, 16
    N = 2

    key = jax.random.PRNGKey(0)
    # Typical upstream: output of a Linear layer, shape (N, c*a*b).
    x = jax.random.normal(key, (N, C * A * B), dtype=jnp.float32)

    y = jax.block_until_ready(lin_view(x, C, A, B))
    y_ref = jnp.reshape(x, (N, C, A, B))
    assert y.shape == (N, C, A, B), y.shape
    assert y.dtype == x.dtype
    assert bool(jnp.array_equal(y, y_ref))

    # Slightly larger batch to exercise the lane-dense (rows, 2048) tiling.
    x_big = jax.random.normal(jax.random.PRNGKey(2), (64, C * A * B), jnp.float32)
    y_big = jax.block_until_ready(lin_view(x_big, C, A, B))
    assert y_big.shape == (64, C, A, B)
    assert bool(jnp.array_equal(y_big, jnp.reshape(x_big, (64, C, A, B))))

    # Fallback branch: a flat vector of size c*a*b -> batch 1 (torch except).
    x_flat = jax.random.normal(jax.random.PRNGKey(1), (C * A * B,), jnp.float32)
    y2 = jax.block_until_ready(lin_view(x_flat, C, A, B))
    assert y2.shape == (1, C, A, B)
    assert bool(jnp.array_equal(y2, jnp.reshape(x_flat, (1, C, A, B))))

    print("KERNEL_OK")
</pallas_src>

<mosaic_0001>
module attributes {stable_mosaic.version = 11 : i64} {
  func.func @_copy_kernel(%arg0: i32, %arg1: memref<1x1024xf32, #tpu.memory_space<vmem>>, %arg2: memref<1x1024xf32, #tpu.memory_space<vmem>>) attributes {dimension_semantics = [#tpu.dimension_semantics<parallel>], iteration_bounds = array<i64: 1>, scalar_prefetch = 0 : i64, scratch_operands = 0 : i64, tpu.core_type = #tpu.core_type<tc>, window_params = [{transform_indices = @transform_0, window_bounds = array<i64: 1, 1024>}, {transform_indices = @transform_1, window_bounds = array<i64: 1, 1024>}]} {
    %c0 = arith.constant 0 : index
    %c0_0 = arith.constant 0 : index
    %0 = vector.load %arg1[%c0, %c0_0] : memref<1x1024xf32, #tpu.memory_space<vmem>>, vector<1x1024xf32>
    %c0_1 = arith.constant 0 : index
    %c0_2 = arith.constant 0 : index
    %1 = vector.load %arg2[%c0_1, %c0_2] : memref<1x1024xf32, #tpu.memory_space<vmem>>, vector<1x1024xf32>
    tpu.vector_store %arg2[%c0_1, %c0_2], %0 {strides = array<i32>} : memref<1x1024xf32, #tpu.memory_space<vmem>>, vector<1x1024xf32>,
    return
  }
  func.func @transform_0(%arg0: i32) -> (i32, i32) {
    %c0_i32 = arith.constant 0 : i32
    %c0_i32_0 = arith.constant 0 : i32
    return %arg0, %c0_i32 : i32, i32
  }
  func.func @transform_1(%arg0: i32) -> (i32, i32) {
    %c0_i32 = arith.constant 0 : i32
    %c0_i32_0 = arith.constant 0 : i32
    return %arg0, %c0_i32 : i32, i32
  }
}

</mosaic_0001>

<bundles_post_ra>
// kernel: tpu_custom_call.1
= control target key start
LH: loop header
LB: loop body
LE: loop exit
PB: predicated region body
PF: predicated region fallthrough
CT: control target
= control target key end

     0   :  { %6 = vsyncpa [#allocation3], 0  ;;  %s114_s0 = inlined_call_operand.hbm [shape: f32[1,1024], index: 0, kind: input, shape index: {}]   ;;  %s115_s1 = inlined_call_operand.hbm [shape: f32[1,1024], index: 1, kind: output, shape index: {}]  }
   0x1   :  { %7 = vsyncpa [#allocation4], 0  ;;  %s13_s8 = sshll.u32 %s114_s0, 4  ;;  %s96_s9 = smov [#allocation2]   ;;  %s14_s8 = int_to_ptr.hbm [resolvable:$true] %s13_s8 }
   0x2   :  { %s15_s10 = sshll.u32 %s96_s9, 4  ;;  %s16_s10 = int_to_ptr.vmem [resolvable:$true] %s15_s10 }
   0x3   :  { %18 = dma.hbm_to_vmem [thread:$0]  %s14_s8, 128, %s16_s10, [#allocation3]  }
   0x4   :  { %92 = dma.done.wait [#allocation3], 128  }
   0x5   :  { %93 = vsyncadd [#allocation3], 4294967168  ;;  %s97_s11 = smov [#allocation5]   ;;  %s32_s15 = sshll.u32 %s115_s1, 4  ;;  %v23_v0 = vld [vmem:[#allocation2] sm:$0xff]  ;;  %s33_s15 = int_to_ptr.hbm [resolvable:$true] %s32_s15 }
   0x6   :  { %s30_s12 = sshll.u32 %s97_s11, 4  ;;  %24 = vst [vmem:[#allocation5] sm:$0xff] %v23_v0  ;;  %s31_s12 = int_to_ptr.vmem [resolvable:$true] %s30_s12 }
   0x7   :  { %35 = dma.vmem_to_hbm [thread:$0]  %s31_s12, 128, %s33_s15, [#allocation4]  }
   0x8   :  { %94 = dma.done.wait [#allocation4], 128  }
   0x9   :  { %95 = vsyncadd [#allocation4], 4294967168 }
   0xa   :  { %40 = vsyncpa [#allocation3], 1 }
   0xb   :  { %41 = vsyncpa [#allocation4], 1 }

</bundles_post_ra>
